<compile_context>
chip_gen: v6e
topology: v6e:2x2x1
jax: 0.10.0
libtpu: 0.0.40
codegen_flags: <defaults>
</compile_context>

<pallas_src>
import functools

import numpy as np
import jax
import jax.numpy as jnp
from jax.experimental import pallas as pl
from jax.experimental.pallas import tpu as pltpu

_BN_EPS = 1e-5


def _round_up(x, m):
    return -(-x // m) * m


# ----------------------------------------------------------------------------
# Fused InceptionBlock kernel.
# Activations live as (C, Bblk*Lp): each batch element owns one Lp-lane segment,
# valid lanes [0, L), padded lanes [L, Lp) are zero (Lp - L >= 2).
# ----------------------------------------------------------------------------
def _inception_kernel(x_ref, mask_ref, w1_ref, h1_ref, w3_ref, h3_ref,
                      w5_ref, h5_ref, wp_ref, hp_ref, o_ref, *,
                      out1, red3, out3, red5, out5, out_pool):
    x = x_ref[...]                              # (Cin, N) bf16, padded lanes are 0
    cin, n = x.shape
    valid = mask_ref[...] != 0.0                # (1, N) bool

    def roll_l(v, d):
        # s[:, l] = v[:, l + d]; wrap-around always lands on padded lanes.
        if d == 0:
            return v
        return pltpu.roll(v, (-d) % n, 1)

    # --- fused 1x1 convs over the shared input (branch1 + 3x3/5x5 reduce convs);
    #     BN scale is folded into w1, epilogue = relu(acc + shift), then zero padded
    #     lanes so the shifted taps below see clean halos.
    y1 = jnp.dot(w1_ref[...], x, preferred_element_type=jnp.float32)
    y1 = jnp.where(valid, jnp.maximum(y1 + h1_ref[...], 0.0), 0.0)
    o_ref[0:out1, :] = y1[0:out1]                                   # branch1
    t2 = y1[out1:out1 + red3]                                       # branch2 reduce
    t3 = y1[out1 + red3:out1 + red3 + red5]                         # branch3 reduce

    # --- branch2: 3-tap "same" conv as a single dot with taps stacked along K.
    t2s = jnp.concatenate([roll_l(t2, -1), t2, roll_l(t2, 1)],
                          axis=0).astype(jnp.bfloat16)              # (3*red3, N)
    y3 = jnp.dot(w3_ref[...], t2s, preferred_element_type=jnp.float32)
    o_ref[out1:out1 + out3, :] = jnp.maximum(y3 + h3_ref[...], 0.0)

    # --- branch3: 5-tap "same" conv, same trick.
    t3s = jnp.concatenate([roll_l(t3, d) for d in (-2, -1, 0, 1, 2)],
                          axis=0).astype(jnp.bfloat16)              # (5*red5, N)
    y5 = jnp.dot(w5_ref[...], t3s, preferred_element_type=jnp.float32)
    o_ref[out1 + out3:out1 + out3 + out5, :] = jnp.maximum(y5 + h5_ref[...], 0.0)

    # --- branch4: 3x3 max-pool over (channel, length), stride 1, pad 1 (-inf pad),
    #     fused with the following 1x1 conv.  Separable max: lane window via
    #     pltpu.roll, channel window via sublane pltpu.roll + boundary masks.
    neg = jnp.float32(-1e30)
    xm = jnp.where(valid, x.astype(jnp.float32), neg)               # -inf padding
    pool_l = jnp.maximum(jnp.maximum(roll_l(xm, -1), xm), roll_l(xm, 1))
    up = pltpu.roll(pool_l, cin - 1, 0)                             # up[c] = pool_l[c+1]
    dn = pltpu.roll(pool_l, 1, 0)                                   # dn[c] = pool_l[c-1]
    crow = jax.lax.broadcasted_iota(jnp.int32, (cin, 1), 0)
    pooled = jnp.maximum(
        jnp.maximum(jnp.where(crow < cin - 1, up, neg), pool_l),
        jnp.where(crow > 0, dn, neg))
    pooled = jnp.where(valid, pooled, 0.0).astype(jnp.bfloat16)     # scrub sentinel
    y4 = jnp.dot(wp_ref[...], pooled, preferred_element_type=jnp.float32)
    o_ref[out1 + out3 + out5:out1 + out3 + out5 + out_pool, :] = \
        jnp.maximum(y4 + hp_ref[...], 0.0)


# ----------------------------------------------------------------------------
# Wrapper: BN folding, weight fusion, layout, pallas_call.
# ----------------------------------------------------------------------------
def inception_block_pallas(x, raw):
    B, Cin, L = x.shape
    Lp = _round_up(L + 2, 128)                  # lane-dense, room for halo taps

    out1 = raw["b1"]["W"].shape[0]
    red3 = raw["b2a"]["W"].shape[0]
    out3 = raw["b2b"]["W"].shape[0]
    red5 = raw["b3a"]["W"].shape[0]
    out5 = raw["b3b"]["W"].shape[0]
    out_pool = raw["b4"]["W"].shape[0]
    Ctot = out1 + out3 + out5 + out_pool

    # Fold BatchNorm: scale into the conv weights, shift kept as a per-channel bias.
    scales, shifts = {}, {}
    for k in ("b1", "b2a", "b2b", "b3a", "b3b", "b4"):
        s = raw[k]["gamma"] / jnp.sqrt(raw[k]["var"] + _BN_EPS)
        scales[k] = s
        shifts[k] = s * (raw[k]["b"] - raw[k]["mean"]) + raw[k]["beta"]

    # Fuse the three 1x1 convs that read the block input into one weight matrix.
    w1 = jnp.concatenate(
        [scales[k][:, None] * raw[k]["W"][:, :, 0] for k in ("b1", "b2a", "b3a")],
        axis=0).astype(jnp.bfloat16)                                # (out1+red3+red5, Cin)
    h1 = jnp.concatenate(
        [shifts[k] for k in ("b1", "b2a", "b3a")]).reshape(-1, 1)

    # k-tap convs flattened tap-major along K: w[o, k*red + c] = W[o, c, k] * scale[o].
    w3 = (scales["b2b"][:, None, None] * raw["b2b"]["W"])
    w3 = jnp.transpose(w3, (0, 2, 1)).reshape(out3, 3 * red3).astype(jnp.bfloat16)
    h3 = shifts["b2b"].reshape(-1, 1)
    w5 = (scales["b3b"][:, None, None] * raw["b3b"]["W"])
    w5 = jnp.transpose(w5, (0, 2, 1)).reshape(out5, 5 * red5).astype(jnp.bfloat16)
    h5 = shifts["b3b"].reshape(-1, 1)
    wp = (scales["b4"][:, None] * raw["b4"]["W"][:, :, 0]).astype(jnp.bfloat16)
    hp = shifts["b4"].reshape(-1, 1)

    # Batch blocking: keep >= 2 grid steps when B > 1 (v7x megacore), cap the block.
    Bblk = max(1, min(32, pl.cdiv(B, 2))) if B > 1 else 1
    n_blocks = pl.cdiv(B, Bblk)
    Bp = n_blocks * Bblk
    Nblk = Bblk * Lp

    # (B, Cin, L) -> (Cin, Bp*Lp) bf16 with zero padded lanes / padded batch rows.
    xt = jnp.transpose(x, (1, 0, 2))
    xt = jnp.pad(xt, ((0, 0), (0, Bp - B), (0, Lp - L)))
    x_flat = xt.reshape(Cin, Bp * Lp).astype(jnp.bfloat16)

    # Per-block lane-validity mask (same for every block: whole segments per block).
    mask = jnp.asarray(
        (np.arange(Nblk) % Lp < L).astype(np.float32)).reshape(1, Nblk)

    flops = 2 * Bp * Lp * (Cin * (out1 + red3 + red5)
                           + 3 * red3 * out3
                           + 5 * red5 * out5
                           + Cin * out_pool)
    bytes_accessed = (2 * x_flat.size + 4 * Ctot * Bp * Lp
                      + 2 * (w1.size + w3.size + w5.size + wp.size)
                      + 4 * (h1.size + h3.size + h5.size + hp.size))

    kernel = functools.partial(
        _inception_kernel, out1=out1, red3=red3, out3=out3,
        red5=red5, out5=out5, out_pool=out_pool)

    def full_spec(a):
        nd = a.ndim
        return pl.BlockSpec(a.shape, lambda b, _n=nd: (0,) * _n)

    out_flat = pl.pallas_call(
        kernel,
        out_shape=jax.ShapeDtypeStruct((Ctot, Bp * Lp), jnp.float32),
        grid=(n_blocks,),
        in_specs=[
            pl.BlockSpec((Cin, Nblk), lambda b: (0, b)),
            pl.BlockSpec((1, Nblk), lambda b: (0, 0)),
            full_spec(w1), full_spec(h1),
            full_spec(w3), full_spec(h3),
            full_spec(w5), full_spec(h5),
            full_spec(wp), full_spec(hp),
        ],
        out_specs=pl.BlockSpec((Ctot, Nblk), lambda b: (0, b)),
        compiler_params=pltpu.CompilerParams(dimension_semantics=("parallel",)),
        cost_estimate=pl.CostEstimate(flops=int(flops), transcendentals=0,
                                      bytes_accessed=int(bytes_accessed)),
    )(x_flat, mask, w1, h1, w3, h3, w5, h5, wp, hp)

    # Back to (B, Ctot, L).  (A consumer that re-pads anyway could take the padded
    # (Ctot, Bp*Lp) slab directly and skip this slice.)
    out = out_flat.reshape(Ctot, Bp, Lp)[:, :B, :L]
    return jnp.transpose(out, (1, 0, 2))


# ----------------------------------------------------------------------------
# Pure-JAX reference (mirrors the PyTorch module, eval-mode BatchNorm)
# ----------------------------------------------------------------------------
def _conv_block_ref(x, p, padding):
    L = x.shape[2]
    y = jax.lax.conv_general_dilated(
        x, p["W"], window_strides=(1,), padding=[(padding, padding)],
        dimension_numbers=("NCH", "OIH", "NCH"),
        precision=jax.lax.Precision.HIGHEST)
    y = y + p["b"][None, :, None]
    y = ((y - p["mean"][None, :, None])
         * (p["gamma"][None, :, None] / jnp.sqrt(p["var"][None, :, None] + _BN_EPS))
         + p["beta"][None, :, None])
    y = jnp.maximum(y, 0.0)
    Lu = y.shape[2]
    left = int(np.floor((L - Lu) / 2))
    right = int(np.ceil((L - Lu) / 2))
    return jnp.pad(y, ((0, 0), (0, 0), (left, right)))


def inception_block_ref(x, raw):
    b1 = _conv_block_ref(x, raw["b1"], 0)
    b2 = _conv_block_ref(_conv_block_ref(x, raw["b2a"], 0), raw["b2b"], 1)
    b3 = _conv_block_ref(_conv_block_ref(x, raw["b3a"], 0), raw["b3b"], 2)
    pooled = jax.lax.reduce_window(
        x, -jnp.inf, jax.lax.max,
        window_dimensions=(1, 3, 3), window_strides=(1, 1, 1),
        padding=((0, 0), (1, 1), (1, 1)))
    b4 = _conv_block_ref(pooled, raw["b4"], 0)
    return jnp.concatenate([b1, b2, b3, b4], axis=1)


# ----------------------------------------------------------------------------
# Deterministic parameter construction
# ----------------------------------------------------------------------------
def _make_convblock_params(key, cin, cout, k):
    ks = jax.random.split(key, 6)
    return dict(
        W=jax.random.normal(ks[0], (cout, cin, k), jnp.float32) / np.sqrt(cin * k),
        b=0.01 * jax.random.normal(ks[1], (cout,), jnp.float32),
        gamma=1.0 + 0.1 * jax.random.normal(ks[2], (cout,), jnp.float32),
        beta=0.1 * jax.random.normal(ks[3], (cout,), jnp.float32),
        mean=0.1 * jax.random.normal(ks[4], (cout,), jnp.float32),
        var=1.0 + 0.1 * jax.random.uniform(ks[5], (cout,), jnp.float32),
    )


# ----------------------------------------------------------------------------
if __name__ == "__main__":
    key = jax.random.PRNGKey(0)
    kx, kp = jax.random.split(key)

    # Small shapes consistent with the module: x is (B, in_channels, L).
    B, Cin, L = 2, 32, 100
    out1, red3, out3, red5, out5, out_pool = 16, 16, 32, 8, 16, 16

    x = jax.random.normal(kx, (B, Cin, L), jnp.float32)
    ks = jax.random.split(kp, 6)
    raw = dict(
        b1=_make_convblock_params(ks[0], Cin, out1, 1),
        b2a=_make_convblock_params(ks[1], Cin, red3, 1),
        b2b=_make_convblock_params(ks[2], red3, out3, 3),
        b3a=_make_convblock_params(ks[3], Cin, red5, 1),
        b3b=_make_convblock_params(ks[4], red5, out5, 5),
        b4=_make_convblock_params(ks[5], Cin, out_pool, 1),
    )

    fwd = jax.jit(inception_block_pallas)
    out = jax.block_until_ready(fwd(x, raw))

    assert out.shape == (B, out1 + out3 + out5 + out_pool, L), out.shape
    assert out.dtype == jnp.float32
    assert bool(jnp.all(jnp.isfinite(out)))

    ref = inception_block_ref(x, raw)
    np.testing.assert_allclose(np.asarray(out), np.asarray(ref), rtol=5e-2, atol=5e-2)

    print("KERNEL_OK")
</pallas_src>

<mosaic_0001>
module attributes {stable_mosaic.version = 11 : i64} {
  func.func @_inception_kernel(%arg0: i32, %arg1: memref<32x128xbf16, #tpu.memory_space<vmem>>, %arg2: memref<1x128xf32, #tpu.memory_space<vmem>>, %arg3: memref<40x32xbf16, #tpu.memory_space<vmem>>, %arg4: memref<40x1xf32, #tpu.memory_space<vmem>>, %arg5: memref<32x48xbf16, #tpu.memory_space<vmem>>, %arg6: memref<32x1xf32, #tpu.memory_space<vmem>>, %arg7: memref<16x40xbf16, #tpu.memory_space<vmem>>, %arg8: memref<16x1xf32, #tpu.memory_space<vmem>>, %arg9: memref<16x32xbf16, #tpu.memory_space<vmem>>, %arg10: memref<16x1xf32, #tpu.memory_space<vmem>>, %arg11: memref<80x128xf32, #tpu.memory_space<vmem>>) attributes {dimension_semantics = [#tpu.dimension_semantics<parallel>], iteration_bounds = array<i64: 2>, scalar_prefetch = 0 : i64, scratch_operands = 0 : i64, tpu.core_type = #tpu.core_type<tc>, window_params = [{transform_indices = @transform_0, window_bounds = array<i64: 32, 128>}, {pipeline_mode = #tpu.pipeline_mode<synchronous>, transform_indices = @transform_1, window_bounds = array<i64: 1, 128>}, {pipeline_mode = #tpu.pipeline_mode<synchronous>, transform_indices = @transform_2, window_bounds = array<i64: 40, 32>}, {pipeline_mode = #tpu.pipeline_mode<synchronous>, transform_indices = @transform_3, window_bounds = array<i64: 40, 1>}, {pipeline_mode = #tpu.pipeline_mode<synchronous>, transform_indices = @transform_4, window_bounds = array<i64: 32, 48>}, {pipeline_mode = #tpu.pipeline_mode<synchronous>, transform_indices = @transform_5, window_bounds = array<i64: 32, 1>}, {pipeline_mode = #tpu.pipeline_mode<synchronous>, transform_indices = @transform_6, window_bounds = array<i64: 16, 40>}, {pipeline_mode = #tpu.pipeline_mode<synchronous>, transform_indices = @transform_7, window_bounds = array<i64: 16, 1>}, {pipeline_mode = #tpu.pipeline_mode<synchronous>, transform_indices = @transform_8, window_bounds = array<i64: 16, 32>}, {pipeline_mode = #tpu.pipeline_mode<synchronous>, transform_indices = @transform_9, window_bounds = array<i64: 16, 1>}, {transform_indices = @transform_10, window_bounds = array<i64: 80, 128>}]} {
    %c0 = arith.constant 0 : index
    %c0_0 = arith.constant 0 : index
    %0 = vector.load %arg1[%c0, %c0_0] : memref<32x128xbf16, #tpu.memory_space<vmem>>, vector<32x128xbf16>
    %c0_1 = arith.constant 0 : index
    %c0_2 = arith.constant 0 : index
    %1 = vector.load %arg2[%c0_1, %c0_2] : memref<1x128xf32, #tpu.memory_space<vmem>>, vector<1x128xf32>
    %cst = arith.constant 0.000000e+00 : f32
    %2 = vector.broadcast %cst : f32 to vector<1x128xf32>
    %3 = arith.cmpf one, %1, %2 : vector<1x128xf32>
    %c0_3 = arith.constant 0 : index
    %c0_4 = arith.constant 0 : index
    %4 = vector.load %arg3[%c0_3, %c0_4] : memref<40x32xbf16, #tpu.memory_space<vmem>>, vector<40x32xbf16>
    %cst_5 = arith.constant dense<0.000000e+00> : vector<40x128xf32>
    %5 = tpu.matmul %4, %0, %cst_5 {dimension_numbers = #tpu.dot_dimension_numbers<[1], [0], [0], [1], [0, 0, 1, 1], [], []>} : vector<40x32xbf16>, vector<32x128xbf16>, vector<40x128xf32> -> vector<40x128xf32>
    %c0_6 = arith.constant 0 : index
    %c0_7 = arith.constant 0 : index
    %6 = vector.load %arg4[%c0_6, %c0_7] : memref<40x1xf32, #tpu.memory_space<vmem>>, vector<40x1xf32>
    %7 = vector.broadcast %6 : vector<40x1xf32> to vector<40x128xf32>
    %8 = arith.addf %5, %7 : vector<40x128xf32>
    %cst_8 = arith.constant 0.000000e+00 : f32
    %9 = vector.broadcast %cst_8 : f32 to vector<40x128xf32>
    %10 = arith.maximumf %8, %9 : vector<40x128xf32>
    %cst_9 = arith.constant 0.000000e+00 : f32
    %11 = vector.shape_cast %3 : vector<1x128xi1> to vector<1x128xi1>
    %12 = vector.broadcast %11 : vector<1x128xi1> to vector<40x128xi1>
    %13 = vector.broadcast %cst_9 : f32 to vector<40x128xf32>
    %14 = arith.select %12, %10, %13 : vector<40x128xi1>, vector<40x128xf32>
    %15 = vector.extract_strided_slice %14 {offsets = [0, 0], sizes = [16, 128], strides = [1, 1]} : vector<40x128xf32> to vector<16x128xf32>
    %c0_10 = arith.constant 0 : index
    %c0_11 = arith.constant 0 : index
    %16 = vector.load %arg11[%c0_10, %c0_11] : memref<80x128xf32, #tpu.memory_space<vmem>>, vector<16x128xf32>
    tpu.vector_store %arg11[%c0_10, %c0_11], %15 {strides = array<i32>} : memref<80x128xf32, #tpu.memory_space<vmem>>, vector<16x128xf32>,
    %17 = vector.extract_strided_slice %14 {offsets = [16, 0], sizes = [16, 128], strides = [1, 1]} : vector<40x128xf32> to vector<16x128xf32>
    %18 = vector.extract_strided_slice %14 {offsets = [32, 0], sizes = [8, 128], strides = [1, 1]} : vector<40x128xf32> to vector<8x128xf32>
    %c1_i32 = arith.constant 1 : i32
    %19 = tpu.dynamic_rotate %17 by %c1_i32 dim 1 : vector<16x128xf32>, i32 -> vector<16x128xf32>
    %c127_i32 = arith.constant 127 : i32
    %20 = tpu.dynamic_rotate %17 by %c127_i32 dim 1 : vector<16x128xf32>, i32 -> vector<16x128xf32>
    %21 = tpu.concatenate %19, %17, %20 in 0 : vector<16x128xf32>, vector<16x128xf32>, vector<16x128xf32> -> vector<48x128xf32>
    %22 = arith.truncf %21 : vector<48x128xf32> to vector<48x128xbf16>
    %c0_12 = arith.constant 0 : index
    %c0_13 = arith.constant 0 : index
    %23 = vector.load %arg5[%c0_12, %c0_13] : memref<32x48xbf16, #tpu.memory_space<vmem>>, vector<32x48xbf16>
    %cst_14 = arith.constant dense<0.000000e+00> : vector<32x128xf32>
    %24 = tpu.matmul %23, %22, %cst_14 {dimension_numbers = #tpu.dot_dimension_numbers<[1], [0], [0], [1], [0, 0, 1, 1], [], []>} : vector<32x48xbf16>, vector<48x128xbf16>, vector<32x128xf32> -> vector<32x128xf32>
    %c0_15 = arith.constant 0 : index
    %c0_16 = arith.constant 0 : index
    %25 = vector.load %arg6[%c0_15, %c0_16] : memref<32x1xf32, #tpu.memory_space<vmem>>, vector<32x1xf32>
    %26 = vector.broadcast %25 : vector<32x1xf32> to vector<32x128xf32>
    %27 = arith.addf %24, %26 : vector<32x128xf32>
    %cst_17 = arith.constant 0.000000e+00 : f32
    %28 = vector.broadcast %cst_17 : f32 to vector<32x128xf32>
    %29 = arith.maximumf %27, %28 : vector<32x128xf32>
    %c16 = arith.constant 16 : index
    %c0_18 = arith.constant 0 : index
    %30 = vector.load %arg11[%c16, %c0_18] : memref<80x128xf32, #tpu.memory_space<vmem>>, vector<32x128xf32>
    tpu.vector_store %arg11[%c16, %c0_18], %29 {strides = array<i32>} : memref<80x128xf32, #tpu.memory_space<vmem>>, vector<32x128xf32>,
    %c2_i32 = arith.constant 2 : i32
    %31 = tpu.dynamic_rotate %18 by %c2_i32 dim 1 : vector<8x128xf32>, i32 -> vector<8x128xf32>
    %c1_i32_19 = arith.constant 1 : i32
    %32 = tpu.dynamic_rotate %18 by %c1_i32_19 dim 1 : vector<8x128xf32>, i32 -> vector<8x128xf32>
    %c127_i32_20 = arith.constant 127 : i32
    %33 = tpu.dynamic_rotate %18 by %c127_i32_20 dim 1 : vector<8x128xf32>, i32 -> vector<8x128xf32>
    %c126_i32 = arith.constant 126 : i32
    %34 = tpu.dynamic_rotate %18 by %c126_i32 dim 1 : vector<8x128xf32>, i32 -> vector<8x128xf32>
    %35 = tpu.concatenate %31, %32, %18, %33, %34 in 0 : vector<8x128xf32>, vector<8x128xf32>, vector<8x128xf32>, vector<8x128xf32>, vector<8x128xf32> -> vector<40x128xf32>
    %36 = arith.truncf %35 : vector<40x128xf32> to vector<40x128xbf16>
    %c0_21 = arith.constant 0 : index
    %c0_22 = arith.constant 0 : index
    %37 = vector.load %arg7[%c0_21, %c0_22] : memref<16x40xbf16, #tpu.memory_space<vmem>>, vector<16x40xbf16>
    %cst_23 = arith.constant dense<0.000000e+00> : vector<16x128xf32>
    %38 = tpu.matmul %37, %36, %cst_23 {dimension_numbers = #tpu.dot_dimension_numbers<[1], [0], [0], [1], [0, 0, 1, 1], [], []>} : vector<16x40xbf16>, vector<40x128xbf16>, vector<16x128xf32> -> vector<16x128xf32>
    %c0_24 = arith.constant 0 : index
    %c0_25 = arith.constant 0 : index
    %39 = vector.load %arg8[%c0_24, %c0_25] : memref<16x1xf32, #tpu.memory_space<vmem>>, vector<16x1xf32>
    %40 = vector.broadcast %39 : vector<16x1xf32> to vector<16x128xf32>
    %41 = arith.addf %38, %40 : vector<16x128xf32>
    %cst_26 = arith.constant 0.000000e+00 : f32
    %42 = vector.broadcast %cst_26 : f32 to vector<16x128xf32>
    %43 = arith.maximumf %41, %42 : vector<16x128xf32>
    %c48 = arith.constant 48 : index
    %c0_27 = arith.constant 0 : index
    %44 = vector.load %arg11[%c48, %c0_27] : memref<80x128xf32, #tpu.memory_space<vmem>>, vector<16x128xf32>
    tpu.vector_store %arg11[%c48, %c0_27], %43 {strides = array<i32>} : memref<80x128xf32, #tpu.memory_space<vmem>>, vector<16x128xf32>,
    %45 = arith.extf %0 : vector<32x128xbf16> to vector<32x128xf32>
    %cst_28 = arith.constant -1.000000e+30 : f32
    %46 = vector.shape_cast %3 : vector<1x128xi1> to vector<1x128xi1>
    %47 = vector.broadcast %46 : vector<1x128xi1> to vector<32x128xi1>
    %48 = vector.broadcast %cst_28 : f32 to vector<32x128xf32>
    %49 = arith.select %47, %45, %48 : vector<32x128xi1>, vector<32x128xf32>
    %c1_i32_29 = arith.constant 1 : i32
    %50 = tpu.dynamic_rotate %49 by %c1_i32_29 dim 1 : vector<32x128xf32>, i32 -> vector<32x128xf32>
    %51 = arith.maximumf %50, %49 : vector<32x128xf32>
    %c127_i32_30 = arith.constant 127 : i32
    %52 = tpu.dynamic_rotate %49 by %c127_i32_30 dim 1 : vector<32x128xf32>, i32 -> vector<32x128xf32>
    %53 = arith.maximumf %51, %52 : vector<32x128xf32>
    %c31_i32 = arith.constant 31 : i32
    %54 = tpu.dynamic_rotate %53 by %c31_i32 dim 0 : vector<32x128xf32>, i32 -> vector<32x128xf32>
    %c1_i32_31 = arith.constant 1 : i32
    %55 = tpu.dynamic_rotate %53 by %c1_i32_31 dim 0 : vector<32x128xf32>, i32 -> vector<32x128xf32>
    %56 = tpu.iota {dimensions = array<i32: 0>} : vector<32x1xi32>
    %c31_i32_32 = arith.constant 31 : i32
    %57 = vector.broadcast %c31_i32_32 : i32 to vector<32x1xi32>
    %58 = arith.cmpi slt, %56, %57 : vector<32x1xi32>
    %cst_33 = arith.constant -1.000000e+30 : f32
    %59 = vector.shape_cast %58 : vector<32x1xi1> to vector<32x1xi1>
    %60 = vector.broadcast %59 : vector<32x1xi1> to vector<32x128xi1>
    %61 = vector.broadcast %cst_33 : f32 to vector<32x128xf32>
    %62 = arith.select %60, %54, %61 : vector<32x128xi1>, vector<32x128xf32>
    %63 = arith.maximumf %62, %53 : vector<32x128xf32>
    %c0_i32 = arith.constant 0 : i32
    %64 = vector.broadcast %c0_i32 : i32 to vector<32x1xi32>
    %65 = arith.cmpi sgt, %56, %64 : vector<32x1xi32>
    %cst_34 = arith.constant -1.000000e+30 : f32
    %66 = vector.shape_cast %65 : vector<32x1xi1> to vector<32x1xi1>
    %67 = vector.broadcast %66 : vector<32x1xi1> to vector<32x128xi1>
    %68 = vector.broadcast %cst_34 : f32 to vector<32x128xf32>
    %69 = arith.select %67, %55, %68 : vector<32x128xi1>, vector<32x128xf32>
    %70 = arith.maximumf %63, %69 : vector<32x128xf32>
    %cst_35 = arith.constant 0.000000e+00 : f32
    %71 = vector.shape_cast %3 : vector<1x128xi1> to vector<1x128xi1>
    %72 = vector.broadcast %71 : vector<1x128xi1> to vector<32x128xi1>
    %73 = vector.broadcast %cst_35 : f32 to vector<32x128xf32>
    %74 = arith.select %72, %70, %73 : vector<32x128xi1>, vector<32x128xf32>
    %75 = arith.truncf %74 : vector<32x128xf32> to vector<32x128xbf16>
    %c0_36 = arith.constant 0 : index
    %c0_37 = arith.constant 0 : index
    %76 = vector.load %arg9[%c0_36, %c0_37] : memref<16x32xbf16, #tpu.memory_space<vmem>>, vector<16x32xbf16>
    %cst_38 = arith.constant dense<0.000000e+00> : vector<16x128xf32>
    %77 = tpu.matmul %76, %75, %cst_38 {dimension_numbers = #tpu.dot_dimension_numbers<[1], [0], [0], [1], [0, 0, 1, 1], [], []>} : vector<16x32xbf16>, vector<32x128xbf16>, vector<16x128xf32> -> vector<16x128xf32>
    %c0_39 = arith.constant 0 : index
    %c0_40 = arith.constant 0 : index
    %78 = vector.load %arg10[%c0_39, %c0_40] : memref<16x1xf32, #tpu.memory_space<vmem>>, vector<16x1xf32>
    %79 = vector.broadcast %78 : vector<16x1xf32> to vector<16x128xf32>
    %80 = arith.addf %77, %79 : vector<16x128xf32>
    %cst_41 = arith.constant 0.000000e+00 : f32
    %81 = vector.broadcast %cst_41 : f32 to vector<16x128xf32>
    %82 = arith.maximumf %80, %81 : vector<16x128xf32>
    %c64 = arith.constant 64 : index
    %c0_42 = arith.constant 0 : index
    %83 = vector.load %arg11[%c64, %c0_42] : memref<80x128xf32, #tpu.memory_space<vmem>>, vector<16x128xf32>
    tpu.vector_store %arg11[%c64, %c0_42], %82 {strides = array<i32>} : memref<80x128xf32, #tpu.memory_space<vmem>>, vector<16x128xf32>,
    return
  }
  func.func @transform_0(%arg0: i32) -> (i32, i32) {
    %c0_i32 = arith.constant 0 : i32
    %c0_i32_0 = arith.constant 0 : i32
    return %c0_i32, %arg0 : i32, i32
  }
  func.func @transform_1(%arg0: i32) -> (i32, i32) {
    %c0_i32 = arith.constant 0 : i32
    %c0_i32_0 = arith.constant 0 : i32
    %c0_i32_1 = arith.constant 0 : i32
    return %c0_i32, %c0_i32_0 : i32, i32
  }
  func.func @transform_2(%arg0: i32) -> (i32, i32) {
    %c0_i32 = arith.constant 0 : i32
    %c0_i32_0 = arith.constant 0 : i32
    %c0_i32_1 = arith.constant 0 : i32
    return %c0_i32, %c0_i32_0 : i32, i32
  }
  func.func @transform_3(%arg0: i32) -> (i32, i32) {
    %c0_i32 = arith.constant 0 : i32
    %c0_i32_0 = arith.constant 0 : i32
    %c0_i32_1 = arith.constant 0 : i32
    return %c0_i32, %c0_i32_0 : i32, i32
  }
  func.func @transform_4(%arg0: i32) -> (i32, i32) {
    %c0_i32 = arith.constant 0 : i32
    %c0_i32_0 = arith.constant 0 : i32
    %c0_i32_1 = arith.constant 0 : i32
    return %c0_i32, %c0_i32_0 : i32, i32
  }
  func.func @transform_5(%arg0: i32) -> (i32, i32) {
    %c0_i32 = arith.constant 0 : i32
    %c0_i32_0 = arith.constant 0 : i32
    %c0_i32_1 = arith.constant 0 : i32
    return %c0_i32, %c0_i32_0 : i32, i32
  }
  func.func @transform_6(%arg0: i32) -> (i32, i32) {
    %c0_i32 = arith.constant 0 : i32
    %c0_i32_0 = arith.constant 0 : i32
    %c0_i32_1 = arith.constant 0 : i32
    return %c0_i32, %c0_i32_0 : i32, i32
  }
  func.func @transform_7(%arg0: i32) -> (i32, i32) {
    %c0_i32 = arith.constant 0 : i32
    %c0_i32_0 = arith.constant 0 : i32
    %c0_i32_1 = arith.constant 0 : i32
    return %c0_i32, %c0_i32_0 : i32, i32
  }
  func.func @transform_8(%arg0: i32) -> (i32, i32) {
    %c0_i32 = arith.constant 0 : i32
    %c0_i32_0 = arith.constant 0 : i32
    %c0_i32_1 = arith.constant 0 : i32
    return %c0_i32, %c0_i32_0 : i32, i32
  }
  func.func @transform_9(%arg0: i32) -> (i32, i32) {
    %c0_i32 = arith.constant 0 : i32
    %c0_i32_0 = arith.constant 0 : i32
    %c0_i32_1 = arith.constant 0 : i32
    return %c0_i32, %c0_i32_0 : i32, i32
  }
  func.func @transform_10(%arg0: i32) -> (i32, i32) {
    %c0_i32 = arith.constant 0 : i32
    %c0_i32_0 = arith.constant 0 : i32
    return %c0_i32, %arg0 : i32, i32
  }
}

</mosaic_0001>

<bundles_post_ra>
// kernel: inception_block_pallas.1
= control target key start
LH: loop header
LB: loop body
LE: loop exit
PB: predicated region body
PF: predicated region fallthrough
CT: control target
= control target key end

     0   :  { %s1316_s13 = smov 0   ;;  %s1318_s14 = smov 0   ;;  %s1603_s0 = inlined_call_operand.vmem [shape: bf16[32,256], index: 0, kind: input, shape index: {}]   ;;  %s1604_s1 = inlined_call_operand.vmem [shape: f32[1,128], index: 1, kind: input, shape index: {}]   ;;  %s1605_s2 = inlined_call_operand.vmem [shape: bf16[40,32], index: 2, kind: input, shape index: {}]   ;;  %s1606_s3 = inlined_call_operand.vmem [shape: f32[40,1], index: 3, kind: input, shape index: {}]   ;;  %s1607_s4 = inlined_call_operand.vmem [shape: bf16[32,48], index: 4, kind: input, shape index: {}]   ;;  %s1608_s5 = inlined_call_operand.vmem [shape: f32[32,1], index: 5, kind: input, shape index: {}]   ;;  %s1609_s6 = inlined_call_operand.vmem [shape: bf16[16,40], index: 6, kind: input, shape index: {}]   ;;  %s1610_s7 = inlined_call_operand.vmem [shape: f32[16,1], index: 7, kind: input, shape index: {}]   ;;  %s1611_s8 = inlined_call_operand.vmem [shape: bf16[16,32], index: 8, kind: input, shape index: {}]   ;;  %s1612_s9 = inlined_call_operand.vmem [shape: f32[16,1], index: 9, kind: input, shape index: {}]   ;;  %s1613_s10 = inlined_call_operand.vmem [shape: f32[80,256], index: 10, kind: output, shape index: {}]  }
   0x1   :  { %s1320_s15 = smov 0  }
   0x2 LB: > { %s1058_s16 = sadd.s32 4294967295, %s1251_s15   ;;  %s1333_s17 = sadd.s32 1, %s1251_s15   ;;  %s1251_s15 = sphi %s1320_s15, %s1619_s15   ;;  %s1247_s14 = sphi %s1318_s14, %s1618_s14   ;;  %s1243_s13 = sphi %s1316_s13, %s1617_s13  }
   0x3   : > { %s24_s18 = ssub.s32 %s1251_s15, %s1333_s17  ;;  %s27_s19 = sadd.s32 1, %s1247_s14 }
   0x4   : > { %p25_p0 = scmp.eq.s32.totalorder %s24_s18, 0  ;;  %p34_p1 = scmp.ne.s32.totalorder %s1247_s14, %s1243_s13 }
   0x5   : > { %p35_p2 = scmp.eq.s32.totalorder %s1251_s15, 0  ;;  %p253_p3 = scmp.eq.s32.totalorder %s1058_s16, 1 }
   0x6   : > { %s1344_s20 = scalar_select %p25_p0, %s1247_s14, %s27_s19  }
   0x7   : > { %p36_p4 = por %p35_p2, %p34_p1  ;;  %p1346_p5 = por %p253_p3, %p34_p1 }
   0x8   : > { %p1061_p6 = scmp.ge.s32.totalorder %s1251_s15, 2 }
   0xa   : > { %302 = sbr.rel (%p1061_p6) target bundleno = 21 (0x15), region = 52 }
   0xf   : > { %305 = sbr.rel (!%p36_p4) target bundleno = 21 (0x15), region = 56  ;;  %s307_s22 = sand.u32 (%p36_p4), 1, %s1247_s14  }
  0x10   : > { %s1063_s23 = sshll.u32 (%p36_p4), %s1251_s15, 2  ;;  %s1062_s24 = sshll.u32 (%p36_p4), %s307_s22, 4 }
  0x11   : > { %s311_s27 = scalar_lea.vmem (%p36_p4), %s1603_s0, %s1063_s23  ;;  %s309_s28 = scalar_lea.vmem (%p36_p4), [#allocation2], %s1062_s24 }
  0x12   : > { %v328_v0 = vld [vmem:[%s311_s27] sm:$0xf] (%p36_p4)  ;;  %v330_v1 = vld [vmem:[%s311_s27 + $0x8] sm:$0xf] (%p36_p4)  ;;  %v332_v2 = vld [vmem:[%s311_s27 + $0x10] sm:$0xf] (%p36_p4) }
  0x13   : > { %329 = vst [vmem:[%s309_s28] sm:$0xf] (%p36_p4), %v328_v0  ;;  %331 = vst [vmem:[%s309_s28 + $0x4] sm:$0xf] (%p36_p4), %v330_v1  ;;  %v334_v3 = vld [vmem:[%s311_s27 + $0x18] sm:$0xf] (%p36_p4) }
  0x14   : > { %333 = vst [vmem:[%s309_s28 + $0x8] sm:$0xf] %v332_v2  ;;  %335 = vst [vmem:[%s309_s28 + $0xc] sm:$0xf] %v334_v3 }
  0x15 PF: > { %p1064_p7 = scmp.ge.s32.totalorder %s1251_s15, 1  ;;  %p366_p8 = scmp.lt.s32.totalorder %s1251_s15, 3 }
  0x17   : > { %p367_p9 = pnand %p1064_p7, %p366_p8 }
  0x18   : > { %s373_s29 = sand.u32 (!%p367_p9), 1, %s1243_s13   ;;  %s1256_s19 = smov (!%p367_p9), 1  }
  0x19   : > { %370 = sbr.rel (%p367_p9) target bundleno = 605 (0x25d), region = 97  ;;  %s1065_s30 = sshll.u32 (!%p367_p9), %s373_s29, 4 }
  0x1a   : > { %s375_s11 = scalar_lea.vmem (!%p367_p9), [#allocation2], %s1065_s30  ;;  %s1257_s22 = smov (!%p367_p9), 127  }
  0x1b   : > { %s1258_s25 = smov (!%p367_p9), 126   ;;  %s1259_s26 = smov (!%p367_p9), 2  }
  0x1c   : > { %s1158_s27 = smul.u32 (!%p367_p9), 80, %s373_s29 }
  0x1e   : > { %v1253_v4 = vmov 0.0   ;;  %vm1254_vm0 = vmmov 0   ;;  %v412_v5 = vld [vmem:[%s375_s11 + $0x8] sm:$0xff]   ;;  %v1364_v6 = vld [vmem:[%s375_s11] sm:$0xff]   ;;  %v1255_v7 = vmov 0   ;;  %vm476_vm1 = vcmask 261120  }
  0x1f   : > { %1114 = vmatprep.subr.bf16.mxu0 %v1253_v4  ;;  %1118 = vmatprep.mubr.msk.bf16.mxu0 %vm1254_vm0, %v1253_v4  ;;  %v423_v8 = vld [vmem:[%s1606_s3 + $0x10] sm:$0xff]  ;;  %v425_v9 = vld [vmem:[%s1606_s3 + $0x20] sm:$0xff]  ;;  %v424_v10 = vld [vmem:[%s1606_s3 + $0x18] sm:$0xff]  ;;  %v548_v14 = vlaneseq  ;;  %v759_v20 = vunpack.c.h.bf16 %v412_v5  ;;  %v756_v21 = vunpack.c.l.bf16 %v1364_v6  ;;  %v758_v25 = vunpack.c.l.bf16 %v412_v5  ;;  %s1552_s13 = scalar_lea.vmem [#allocation3], %s1158_s27 }
  0x20   : > { %1191 = vset.pattern.permute.xlu0 %v1255_v7  ;;  %1192 = vset.pattern.permute.xlu1 %v1255_v7  ;;  %v1220_v11 = vld [vmem:[%s1605_s2] sm:$0xff]   ;;  %v1221_v12 = vld [vmem:[%s1605_s2 + $0x8] sm:$0xff]   ;;  %v1222_v13 = vld [vmem:[%s1605_s2 + $0x10] ss:$0 sps:$4 sm:$0xff]   ;;  %v757_v49 = vunpack.c.h.bf16 %v1364_v6  ;;  %vm609_vm4 = vcmask 392192   ;;  %vm707_vm8 = vcmask 1043456  }
  0x21   : > { %438 = vperm.xlu0 %1191, %v423_v8   ;;  %1115 = vmatpush3.bf16.msra.mxu0 %v412_v5  ;;  %v414_v15 = vld [vmem:[%s1604_s1] sm:$0x1]  ;;  %v1399_v16 = vshrl.u32 %v548_v14, 7  ;;  %v577_v60 = vld [vmem:[%s1608_s5 + $0x10] sm:$0xff]  ;;  %v422_v62 = vld [vmem:[%s1606_s3 + $0x8] sm:$0xff]  ;;  %vm1260_vm11 = vmmov 1  }
  0x22   : > { %448 = vperm.xlu1 %1192, %v425_v9   ;;  %1116 = vmatprep.subr.bf16.mxu0 %v1253_v4  ;;  %vm415_vm2 = vcmp.ne.f32.partialorder %v414_v15, 0.0  ;;  %v1223_v52 = vld [vmem:[%s1607_s4] sm:$0xff]   ;;  %v576_v0 = vld [vmem:[%s1608_s5 + $0x8] sm:$0xff]  ;;  %v578_v1 = vld [vmem:[%s1608_s5 + $0x18] sm:$0xff]  ;;  %vm703_vm13 = vcmask 326656  }
  0x23   : > { %v550_v17 = vsub.s32 0, %v1399_v16  ;;  %v547_v18 = vsel %vm415_vm2, 1, %v1255_v7  ;;  %1136 = vmatprep.mubr.msk.bf16.mxu1 %vm609_vm4, %v1223_v52  ;;  %v421_v58 = vld [vmem:[%s1606_s3] sm:$0xff]  ;;  %v687_v2 = vld [vmem:[%s1610_s7 + $0x8] sm:$0xff]  ;;  %vm794_vm5 = vcmp.lt.s32.totalorder %v1399_v16, 7  ;;  %vm803_vm9 = vcmp.lt.s32.totalorder %v1399_v16, 1 }
  0x24   : > { %v575_v59 = vld [vmem:[%s1608_s5] sm:$0xff]  ;;  %v860_v3 = vld [vmem:[%s1612_s9 + $0x8] sm:$0xff]  ;;  %vm831_vm10 = vcmp.gt.s32.totalorder %v1399_v16, 0 }
  0x25   : > { %443 = vperm.xlu0 %1191, %v424_v10   ;;  %1117 = vmatpush3.bf16.msra.mxu0 %v1364_v6  ;;  %v1402_v19 = vrot.slane %v547_v18, %v550_v17  ;;  %v686_v61 = vld [vmem:[%s1610_s7] sm:$0xff] }
  0x26   : > { %1150 = vmatprep.subr.bf16.mxu0 %v1253_v4  ;;  %v859_v63 = vld [vmem:[%s1612_s9] sm:$0xff] }
  0x27   : > { %vm552_vm3 = vcmp.eq.s32.totalorder %v1402_v19, 1 }
  0x28   : > { %1119 = vmatmul.mubr.msk.bf16.vlgmr.msra.gmra.mxu0 %vm476_vm1, %v1220_v11  ;;  %v1408_v22 = vsel %vm552_vm3, %v756_v21, -1e+30  ;;  %v1412_v23 = vsel %vm552_vm3, %v759_v20, -1e+30  ;;  %v1420_v26 = vsel %vm552_vm3, %v758_v25, -1e+30  ;;  %vm1499_vm6 = vmpackc.low %vm552_vm3, %vm552_vm3 }
  0x29   : > { %1122 = vmatprep.mubr.msk.bf16.mxu0 %vm1254_vm0, %v1253_v4  ;;  %v1193_v24 = vpack.i.bf16 %v1412_v23, %v1408_v22  ;;  %v1450_v56 = vsel %vm552_vm3, %v757_v49, -1e+30  ;;  %v810_v21 = vadd.s32 24, %v1399_v16  ;;  %vm1082_vm12 = vmpackc.low %vm1260_vm11, %vm552_vm3 }
  0x2b   : > { %1194 = vrot.lane.b32.xlu0 %v1193_v24, %s1256_s19  ;;  %vm814_vm7 = vcmp.lt.s32.totalorder %v810_v21, 31 }
  0x2f   : > { %1209 = vrot.lane.b32.xlu0 %v1193_v24, %s1257_s22 }
  0x30   : > { %1123 = vmatmul.mubr.msk.bf16.gmra.mxu0 %vm476_vm1, %v1221_v12 }
  0x31   : > { %1126 = vmatprep.mubr.msk.bf16.mxu0 %vm1254_vm0, %v1253_v4 }
  0x33   : > { %780 = vrot.lane.b32.xlu0 %v1420_v26, %s1257_s22 }
  0x38   : > { %1127 = vmatmul.mubr.msk.bf16.gmra.mxu0 %vm476_vm1, %v1222_v13 }
  0x39   : > { %1154 = vmatprep.mubr.msk.bf16.mxu0 %vm1254_vm0, %v1253_v4 }
  0x9c   : > { %v439_v30 = vpop.permute.xlu0 %438 }
  0x9d   : > { %v449_v40 = vpop.permute.xlu1 %448 }
  0xa0   : > { %v444_v35 = vpop.permute.xlu0 %443 }
  0xa4   : > { %v1195_v5 = vpop.permute.xlu0 %1194 }
  0xa5   : > { %v1197_v6 = vunpack.i.h.bf16 %v1195_v5  ;;  %v1196_v7 = vunpack.i.l.bf16 %v1195_v5 }
  0xa7   : > { %v775_v9 = vmax.f32 %v1197_v6, %v1412_v23  ;;  %v772_v10 = vmax.f32 %v1196_v7, %v1408_v22 }
  0xa8   : > { %v1210_v8 = vpop.permute.xlu0 %1209 }
  0xa9   : > { %v1212_v11 = vunpack.i.h.bf16 %v1210_v8  ;;  %v1211_v12 = vunpack.i.l.bf16 %v1210_v8 }
  0xab   : > { %v1491_v13 = vmax.f32 %v772_v10, %v1211_v12  ;;  %v787_v14 = vmax.f32 %v775_v9, %v1212_v11 }
  0xac   : > { %v781_v20 = vpop.permute.xlu0 %780 }
  0xad   : > { %v788_v24 = vrot.slane %v1491_v13, 1  ;;  %v791_v25 = vrot.slane %v787_v14, 1 }
  0xe8   : > { %v1424_v27 = vpop.f32.mrf.mxu0 }
  0xea   : > { %v1120_v28 = vpop.f32.mrf.mxu0 }
  0xec   : > { %v1426_v29 = vpop.f32.mrf.mxu0 }
  0xee   : > { %v1121_v31 = vpop.f32.mrf.mxu0 }
  0xef   : > { %v798_v31 = vsel %vm794_vm5, %v791_v25, %v788_v24 }
  0xf0   : > { %v528_v32 = vpop.f32.mrf.mxu0 }
  0xf1   : > { %v529_v33 = vadd.f32 %v528_v32, %v439_v30 }
  0xf2   : > { %v1124_v34 = vpop.f32.mrf.mxu0 }
  0xf3   : > { %v544_v37 = vmax.f32 %v529_v33, 0.0 }
  0xf4   : > { %v531_v36 = vpop.f32.mrf.mxu0 }
  0xf5   : > { %v532_v38 = vadd.f32 %v531_v36, %v444_v35  ;;  %v555_v43 = vsel %vm552_vm3, %v544_v37, 0.0 }
  0xf6   : > { %v1125_v39 = vpop.f32.mrf.mxu0  ;;  %v1203_v54 = vpack.i.bf16 %v555_v43, %v1420_v26 }
  0xf7   : > { %v545_v41 = vmax.f32 %v532_v38, 0.0  ;;  %v826_v39 = vsel %vm814_vm7, %v798_v31, -1e+30 }
  0xf8   : > { %v536_v42 = vpop.f32.mrf.mxu0 }
  0xf9   : > { %v556_v44 = vsel %vm552_vm3, %v545_v41, 0.0  ;;  %v1432_v45 = vpack.c.bf16 %v545_v41, %v544_v37  ;;  %v1434_v46 = vadd.f32 %v536_v42, %v449_v40 }
  0xfa   : > { %v1198_v47 = vpack.i.bf16 %v556_v44, %v555_v43  ;;  %v1128_v48 = vpop.f32.mrf.mxu0  ;;  %v1213_v57 = vpack.i.bf16 %v1450_v56, %v556_v44  ;;  %v799_v44 = vrot.slane %v1491_v13, 7 }
  0xfb   : > { %v546_v50 = vmax.f32 %v1434_v46, 0.0 }
  0xfc   : > { %1199 = vrot.lane.b32.xlu1 %v1198_v47, %s1257_s22  ;;  %v539_v51 = vpop.f32.mrf.mxu0  ;;  %v802_v47 = vrot.slane %v787_v14, 7 }
  0xfd   : > { %v557_v53 = vsel %vm552_vm3, %v546_v50, 0.0 }
  0xfe   : > { %679 = vrot.lane.b32.xlu0 %v557_v53, %s1258_s25  ;;  %v1129_v55 = vpop.f32.mrf.mxu0 }
 0x100   : > { %1204 = vrot.lane.b32.xlu1 %v1203_v54, %s1256_s19 }
 0x102   : > { %673 = vrot.lane.b32.xlu0 %v557_v53, %s1259_s26 }
 0x104   : > { %1214 = vrot.lane.b32.xlu1 %v1213_v57, %s1256_s19 }
 0x106   : > { %428 = vperm.xlu0 %1191, %v421_v58  }
 0x108   : > { %778 = vrot.lane.b32.xlu1 %v1450_v56, %s1257_s22 }
 0x10a   : > { %581 = vperm.xlu0 %1191, %v575_v59   ;;  %v807_v59 = vsel %vm803_vm9, %v802_v47, %v799_v44 }
 0x10b   : > { %v843_v5 = vsel %vm831_vm10, %v807_v59, -1e+30 }
 0x10c   : > { %677 = vrot.lane.b32.xlu1 %v557_v53, %s1257_s22  ;;  %s1094_s22 = sshll.u32 (%p1346_p5), %s1058_s16, 3 }
 0x10d   : > { %s932_s21 = scalar_lea.vmem (%p1346_p5), %s1613_s10, %s1094_s22 }
 0x10e   : > { %591 = vperm.xlu0 %1191, %v577_v60  }
 0x110   : > { %675 = vrot.lane.b32.xlu1 %v557_v53, %s1256_s19  ;;  %v830_v53 = vmax.f32 %v826_v39, %v787_v14 }
 0x112   : > { %690 = vperm.xlu0 %1191, %v686_v61  }
 0x114   : > { %433 = vperm.xlu1 %1192, %v422_v62  }
 0x116   : > { %863 = vperm.xlu0 %1191, %v859_v63  }
 0x118   : > { %586 = vperm.xlu1 %1192, %v576_v0  }
 0x11c   : > { %596 = vperm.xlu1 %1192, %v578_v1  }
 0x120   : > { %695 = vperm.xlu1 %1192, %v687_v2  }
 0x124   : > { %868 = vperm.xlu1 %1192, %v860_v3  }
 0x16e   : > { %v1200_v15 = vpop.permute.xlu1 %1199 }
 0x16f   : > { %v1202_v17 = vunpack.i.h.bf16 %v1200_v15  ;;  %v1201_v18 = vunpack.i.l.bf16 %v1200_v15  ;;  %v1226_v15 = vld [vmem:[%s1611_s8] sm:$0xff]  }
 0x170   : > { %v680_v33 = vpop.permute.xlu0 %679 }
 0x171   : > { %v570_v28 = vpack.c.bf16 %v1202_v17, %v1201_v18  ;;  %v683_v40 = vpack.c.bf16 %v680_v33, %v680_v33 }
 0x172   : > { %v1205_v23 = vpop.permute.xlu1 %1204 }
 0x173   : > { %v1206_v30 = vunpack.i.l.bf16 %v1205_v23  ;;  %1130 = vmatprep.subr.bf16.mxu1 %v570_v28  ;;  %v1207_v35 = vunpack.i.h.bf16 %v1205_v23  ;;  %v709_v55 = vsel %vm707_vm8, %v683_v40, 0 }
 0x174   : > { %1131 = vmatpush3.bf16.msra.mxu1 %v570_v28  ;;  %v674_v52 = vpop.permute.xlu0 %673 }
 0x175   : > { %v774_v32 = vmax.f32 %v1206_v30, %v1420_v26  ;;  %1132 = vmatprep.subr.msk.bf16.mxu1 %vm1499_vm6, %v1432_v45 }
 0x176   : > { %v1215_v34 = vpop.permute.xlu1 %1214 }
 0x177   : > { %v786_v36 = vmax.f32 %v774_v32, %v781_v20  ;;  %v1217_v37 = vunpack.i.h.bf16 %v1215_v34  ;;  %v1216_v38 = vunpack.i.l.bf16 %v1215_v34 }
 0x178   : > { %1133 = vmatpush3.bf16.msk.msra.mxu1 %vm1499_vm6, %v1432_v45  ;;  %v1224_v45 = vld [vmem:[%s1607_s4 + $0x8] sm:$0xff]  }
 0x179   : > { %v790_v41 = vrot.slane %v786_v36, 1  ;;  %v801_v42 = vrot.slane %v786_v36, 7  ;;  %v568_v43 = vpack.c.bf16 %v1216_v38, %v1207_v35  ;;  %v773_v26 = vmax.f32 %v1217_v37, %v1450_v56 }
 0x17a   : > { %v779_v48 = vpop.permute.xlu1 %778 }
 0x17b   : > { %v795_v49 = vsel %vm794_vm5, %v790_v41, %v791_v25  ;;  %v785_v51 = vmax.f32 %v773_v26, %v779_v48  ;;  %1134 = vmatprep.subr.bf16.mxu1 %v568_v43  ;;  %v804_v54 = vsel %vm803_vm9, %v801_v42, %v802_v47 }
 0x17c   : > { %1135 = vmatpush3.bf16.msra.mxu1 %v568_v43  ;;  %v829_v58 = vmax.f32 %v795_v49, %v786_v36  ;;  %v850_v0 = vmax.f32 %v830_v53, %v804_v54 }
 0x17d   : > { %v789_v56 = vrot.slane %v785_v51, 1  ;;  %v800_v57 = vrot.slane %v785_v51, 7  ;;  %1140 = vmatprep.subr.bf16.mxu1 %v1253_v4 }
 0x17e   : > { %v678_v60 = vpop.permute.xlu1 %677 }
 0x17f   : > { %v796_v61 = vsel %vm794_vm5, %v789_v56, %v790_v41  ;;  %v797_v62 = vsel %vm794_vm5, %v788_v24, %v789_v56  ;;  %v805_v63 = vsel %vm803_vm9, %v800_v57, %v801_v42  ;;  %1137 = vmatmul.mubr.msk.bf16.vlgmr.msra.gmra.mxu1 %vm609_vm4, %v1224_v45  ;;  %v806_v6 = vsel %vm803_vm9, %v799_v44, %v800_v57 }
 0x180   : > { %v827_v1 = vmax.f32 %v797_v62, %v1491_v13  ;;  %v828_v2 = vmax.f32 %v796_v61, %v785_v51  ;;  %v849_v3 = vmax.f32 %v829_v58, %v805_v63  ;;  %1141 = vmatpush3.bf16.msra.mxu1 %v709_v55  ;;  %v1083_v7 = vpack.c.bf16 %v678_v60, %v546_v50 }
 0x181   : > { %v429_v8 = vpop.permute.xlu0 %428  ;;  %1142 = vmatprep.subr.bf16.mxu1 %v1253_v4  ;;  %1146 = vmatprep.mubr.msk.bf16.mxu1 %vm1254_vm0, %v1253_v4 }
 0x182   : > { %v847_v9 = vmax.f32 %v827_v1, %v843_v5  ;;  %v848_v10 = vmax.f32 %v828_v2, %v806_v6  ;;  %v521_v11 = vadd.f32 %v1424_v27, %v429_v8  ;;  %v1088_v12 = vpack.c.bf16 %v850_v0, %v849_v3  ;;  %v676_v16 = vpop.permute.xlu1 %675  ;;  %v1225_v27 = vld [vmem:[%s1609_s6] sm:$0xff]  }
 0x183   : > { %v681_v14 = vpack.c.bf16 %v676_v16, %v674_v52 }
 0x184   : > { %v542_v13 = vmax.f32 %v521_v11, 0.0  ;;  %1143 = vmatpush3.bf16.msk.msra.mxu1 %vm1082_vm12, %v1083_v7  ;;  %1151 = vmatpush3.bf16.msk.msra.mxu0 %vm1499_vm6, %v1088_v12  ;;  %v1091_v46 = vpack.c.bf16 %v848_v10, %v847_v9 }
 0x185   : > { %1144 = vmatprep.subr.bf16.mxu1 %v1253_v4  ;;  %1152 = vmatprep.subr.bf16.mxu0 %v1253_v4  ;;  %v582_v21 = vpop.permute.xlu0 %581 }
 0x186   : > { %v553_v50 = vsel %vm552_vm3, %v542_v13, 0.0 }
 0x187   : > { %558 = vst [vmem:[%s1552_s13] sm:$0xff] %v553_v50 }
 0x188   : > { %1145 = vmatpush3.bf16.msra.mxu1 %v681_v14  ;;  %1153 = vmatpush3.bf16.msk.msra.mxu0 %vm1499_vm6, %v1091_v46 }
 0x189   : > { %v592_v25 = vpop.permute.xlu0 %591 }
 0x18b   : > { %1147 = vmatmul.mubr.msk.bf16.vlgmr.msra.gmra.mxu1 %vm703_vm13, %v1225_v27  ;;  %1155 = vmatmul.mubr.msk.bf16.vlgmr.msra.gmra.mxu0 %vm476_vm1, %v1226_v15 }
 0x18d   : > { %v691_v34 = vpop.permute.xlu0 %690 }
 0x18e   : > { %v979_v59 = vld [vmem:[%s1552_s13] sm:$0xff] (%p1346_p5) }
 0x18f   : > { %v434_v4 = vpop.permute.xlu1 %433  ;;  %980 = vst [vmem:[%s932_s21] sm:$0xff] (%p1346_p5), %v979_v59 }
 0x190   : > { %v524_v17 = vadd.f32 %v1426_v29, %v434_v4 }
 0x191   : > { %v864_v40 = vpop.permute.xlu0 %863 }
 0x192   : > { %v543_v18 = vmax.f32 %v524_v17, 0.0 }
 0x193   : > { %v587_v24 = vpop.permute.xlu1 %586 }
 0x194   : > { %v554_v20 = vsel %vm552_vm3, %v543_v18, 0.0 }
 0x195   : > { %559 = vst [vmem:[%s1552_s13 + $0x8] sm:$0xff] %v554_v20 }
 0x197   : > { %v597_v30 = vpop.permute.xlu1 %596 }
 0x19b   : > { %v696_v38 = vpop.permute.xlu1 %695 }
 0x19c   : > { %v981_v60 = vld [vmem:[%s1552_s13 + $0x8] sm:$0xff] (%p1346_p5) }
 0x19d   : > { %982 = vst [vmem:[%s932_s21 + $0x10] sm:$0xff] (%p1346_p5), %v981_v60 }
 0x19f   : > { %v869_v48 = vpop.permute.xlu1 %868 }
 0x23f   : > { %v1138_v28 = vpop.f32.mrf.mxu1 }
 0x240   : > { %v659_v23 = vadd.f32 %v1138_v28, %v592_v25 }
 0x241   : > { %v650_v22 = vpop.f32.mrf.mxu1 }
 0x242   : > { %v667_v31 = vmax.f32 %v659_v23, 0.0  ;;  %v651_v32 = vadd.f32 %v650_v22, %v582_v21 }
 0x243   : > { %v1139_v33 = vpop.f32.mrf.mxu1 }
 0x244   : > { %671 = vst [vmem:[%s1552_s13 + $0x20] sm:$0xff] %v667_v31  ;;  %v665_v29 = vmax.f32 %v651_v32, 0.0  ;;  %v662_v35 = vadd.f32 %v1139_v33, %v597_v30 }
 0x245   : > { %v653_v19 = vpop.f32.mrf.mxu1 }
 0x246   : > { %669 = vst [vmem:[%s1552_s13 + $0x10] sm:$0xff] %v665_v29  ;;  %v668_v36 = vmax.f32 %v662_v35, 0.0  ;;  %v654_v37 = vadd.f32 %v653_v19, %v587_v24 }
 0x248   : > { %672 = vst [vmem:[%s1552_s13 + $0x28] sm:$0xff] %v668_v36  ;;  %v666_v39 = vmax.f32 %v654_v37, 0.0 }
 0x24a   : > { %670 = vst [vmem:[%s1552_s13 + $0x18] sm:$0xff] %v666_v39 }
 0x24b   : > { %v745_v41 = vpop.f32.mrf.mxu1  ;;  %v913_v42 = vpop.f32.mrf.mxu0  ;;  %v987_v63 = vld [vmem:[%s1552_s13 + $0x20] sm:$0xff] (%p1346_p5) }
 0x24c   : > { %v746_v43 = vadd.f32 %v745_v41, %v691_v34  ;;  %v914_v26 = vadd.f32 %v913_v42, %v864_v40  ;;  %988 = vst [vmem:[%s932_s21 + $0x40] sm:$0xff] (%p1346_p5), %v987_v63 }
 0x24d   : > { %v1148_v44 = vpop.f32.mrf.mxu1  ;;  %v1156_v47 = vpop.f32.mrf.mxu0  ;;  %v983_v61 = vld [vmem:[%s1552_s13 + $0x10] sm:$0xff] (%p1346_p5) }
 0x24e   : > { %v752_v49 = vmax.f32 %v746_v43, 0.0  ;;  %v920_v51 = vmax.f32 %v914_v26, 0.0  ;;  %984 = vst [vmem:[%s932_s21 + $0x20] sm:$0xff] (%p1346_p5), %v983_v61 }
 0x24f   : > { %v748_v52 = vpop.f32.mrf.mxu1  ;;  %v916_v45 = vpop.f32.mrf.mxu0  ;;  %v989_v0 = vld [vmem:[%s1552_s13 + $0x28] sm:$0xff] (%p1346_p5) }
 0x250   : > { %754 = vst [vmem:[%s1552_s13 + $0x30] sm:$0xff] %v752_v49  ;;  %922 = vst [vmem:[%s1552_s13 + $0x40] sm:$0xff] %v920_v51  ;;  %v749_v53 = vadd.f32 %v748_v52, %v696_v38  ;;  %v917_v54 = vadd.f32 %v916_v45, %v869_v48  ;;  %930 = sbr.rel (!%p1346_p5) target bundleno = 605 (0x25d), region = 105 }
 0x251   : > { %v1149_v55 = vpop.f32.mrf.mxu1  ;;  %v1157_v56 = vpop.f32.mrf.mxu0  ;;  %v985_v62 = vld [vmem:[%s1552_s13 + $0x18] sm:$0xff] (%p1346_p5)  ;;  %990 = vst [vmem:[%s932_s21 + $0x50] sm:$0xff] (%p1346_p5), %v989_v0 }
 0x252   : > { %v753_v57 = vmax.f32 %v749_v53, 0.0  ;;  %v921_v58 = vmax.f32 %v917_v54, 0.0  ;;  %986 = vst [vmem:[%s932_s21 + $0x30] sm:$0xff] (%p1346_p5), %v985_v62 }
 0x254   : > { %755 = vst [vmem:[%s1552_s13 + $0x38] sm:$0xff] %v753_v57  ;;  %923 = vst [vmem:[%s1552_s13 + $0x48] sm:$0xff] %v921_v58 }
 0x257   : > { %v991_v1 = vld [vmem:[%s1552_s13 + $0x30] sm:$0xff]  ;;  %v995_v3 = vld [vmem:[%s1552_s13 + $0x40] sm:$0xff] }
 0x258   : > { %992 = vst [vmem:[%s932_s21 + $0x60] sm:$0xff] %v991_v1  ;;  %996 = vst [vmem:[%s932_s21 + $0x80] sm:$0xff] %v995_v3 }
 0x25b   : > { %v993_v2 = vld [vmem:[%s1552_s13 + $0x38] sm:$0xff]  ;;  %v997_v5 = vld [vmem:[%s1552_s13 + $0x48] sm:$0xff] }
 0x25c   : > { %994 = vst [vmem:[%s932_s21 + $0x70] sm:$0xff] %v993_v2  ;;  %998 = vst [vmem:[%s932_s21 + $0x90] sm:$0xff] %v997_v5 }
 0x25d PF: > { %p17_p10 = scmp.ge.s32.totalorder %s1333_s17, 4   ;;  %s1617_s13 = smov %s1247_s14 }
 0x25e   : > { %s1618_s14 = smov %s1344_s20  ;;  %s1619_s15 = smov %s1333_s17 }
 0x25f   :  { %19 = sbr.rel (!%p17_p10) target bundleno = 2 (0x2), region = 174 }

</bundles_post_ra>
